<compile_context>
chip_gen: v7x
topology: tpu7x:2x2x1
jax: 0.10.0
libtpu: 0.0.40
codegen_flags: <defaults>
</compile_context>

<pallas_src>
import numpy as np

import jax
import jax.numpy as jnp
from jax.experimental import pallas as pl
from jax.experimental.pallas import tpu as pltpu


def _pick_tile(itemsize: int, vmem_budget_bytes: int = 10 * 1024 * 1024) -> int:
    # Resident per step: 2 inputs x 2 pipeline buffers + 2 VMEM scratch tiles.
    for t in (1024, 512, 256, 128):
        if 6 * t * t * itemsize <= vmem_budget_bytes:
            return t
    return 128


def _make_pair_kernel(tile: int, num_blocks: int, rem: int, out_dtype, denom: float):
    last = num_blocks - 1

    def kernel(r_idx_ref, c_idx_ref, a_ref, at_ref, out_ref, s_ref, st_ref, sems):
        p = pl.program_id(0)
        r = r_idx_ref[p]                      # row-block index   (r <= c)
        c = c_idx_ref[p]                      # col-block index

        # S = (A[r,c] + A[c,r].T) / i  ; padded edge regions hold garbage but
        # are never DMA'd back to HBM.
        s = (a_ref[...] + at_ref[...].T) / denom
        s_cast = s.astype(out_dtype)
        s_ref[...] = s_cast                   # tile for out[r, c]
        st_ref[...] = s_cast.T                # tile for out[c, r]

        r0 = r * tile
        c0 = c * tile
        mirror = r != c                       # diagonal blocks: single write

        def write(hr, hc):                    # hr, hc are static Python ints
            cp_fwd = pltpu.make_async_copy(
                s_ref.at[:hr, :hc],
                out_ref.at[pl.ds(r0, hr), pl.ds(c0, hc)],
                sems.at[0],
            )

            def cp_mir():
                return pltpu.make_async_copy(
                    st_ref.at[:hc, :hr],
                    out_ref.at[pl.ds(c0, hc), pl.ds(r0, hr)],
                    sems.at[1],
                )

            cp_fwd.start()

            @pl.when(mirror)
            def _():
                cp_mir().start()

            cp_fwd.wait()

            @pl.when(mirror)
            def _():
                cp_mir().wait()

        if rem == tile:
            # N divisible by tile (or single full-extent block): one shape.
            write(tile, tile)
        else:
            # Upper triangle => r == last implies c == last: 3 static cases.
            @pl.when(c != last)
            def _():
                write(tile, tile)

            @pl.when(jnp.logical_and(c == last, r != last))
            def _():
                write(tile, rem)

            @pl.when(r == last)
            def _():
                write(rem, rem)

    return kernel


def symmetry(adj: jax.Array, i=2, *, tile: int | None = None) -> jax.Array:
    """(adj + adj.T) / i for a dense square matrix."""
    if adj.ndim != 2 or adj.shape[0] != adj.shape[1]:
        raise ValueError("dense square adjacency expected")
    N = adj.shape[0]
    itemsize = jnp.dtype(adj.dtype).itemsize
    if tile is None:
        tile = _pick_tile(itemsize)
    if N <= tile:
        tile = N                       # single full-extent block: always legal
    elif tile % 128 != 0:
        raise ValueError("tile must be a multiple of 128 for multi-block grids")

    num_blocks = -(-N // tile)                      # ceil div
    rem = N - (num_blocks - 1) * tile               # size of the last block

    # Upper-triangle block pairs (r <= c), static per (N, tile).
    rs, cs = np.triu_indices(num_blocks)
    r_idx = jnp.asarray(rs, dtype=jnp.int32)
    c_idx = jnp.asarray(cs, dtype=jnp.int32)
    num_pairs = int(rs.shape[0])

    kernel = _make_pair_kernel(tile, num_blocks, rem, adj.dtype, float(i))

    grid_spec = pltpu.PrefetchScalarGridSpec(
        num_scalar_prefetch=2,                      # r_idx, c_idx -> SMEM
        grid=(num_pairs,),
        in_specs=[
            pl.BlockSpec((tile, tile), lambda p, ri, ci: (ri[p], ci[p])),  # A[r, c]
            pl.BlockSpec((tile, tile), lambda p, ri, ci: (ci[p], ri[p])),  # A[c, r]
        ],
        out_specs=pl.BlockSpec(memory_space=pl.ANY),     # raw HBM, manual DMA
        scratch_shapes=[
            pltpu.VMEM((tile, tile), adj.dtype),         # S tile
            pltpu.VMEM((tile, tile), adj.dtype),         # S.T tile
            pltpu.SemaphoreType.DMA((2,)),               # fwd / mirror write sems
        ],
    )

    return pl.pallas_call(
        kernel,
        out_shape=jax.ShapeDtypeStruct((N, N), adj.dtype),
        grid_spec=grid_spec,
        compiler_params=pltpu.CompilerParams(
            dimension_semantics=("parallel",),
        ),
    )(r_idx, c_idx, adj, adj)


class Symmetry:
    """JAX/Pallas port of opengsl Symmetry: forward(adj) = (adj + adj.T) / i."""

    def __init__(self, i=2):
        self.i = i

    def __call__(self, adj):
        return symmetry(adj, self.i)


def _reference(adj, i):
    return (adj + adj.T) / jnp.float32(i)


if __name__ == "__main__":
    key = jax.random.PRNGKey(0)
    failures = []

    def check(name, out, ref):
        out = jax.block_until_ready(out)
        if not jnp.allclose(out, ref, atol=1e-5, rtol=1e-5):
            failures.append(
                f"{name}: max err {float(jnp.max(jnp.abs(out - ref)))}")

    # 1) Small matrix -> single full-extent block; two denominators.
    adj = jax.random.uniform(key, (256, 256), dtype=jnp.float32)
    for i in (2, 3):
        check(f"single-block i={i}", Symmetry(i)(adj), _reference(adj, i))

    # 2) Multi-block, divisible N: 3x3 blocks -> 6 upper-triangle pairs.
    adj3 = jax.random.normal(jax.random.PRNGKey(1), (384, 384), dtype=jnp.float32)
    check("tiled divisible", symmetry(adj3, 2, tile=128), _reference(adj3, 2))

    # 3) Multi-block, ragged N: 200 = 128 + 72 -> edge blocks of 72 rows/cols.
    adj2 = jax.random.normal(jax.random.PRNGKey(2), (200, 200), dtype=jnp.float32)
    check("tiled ragged", symmetry(adj2, 3, tile=128), _reference(adj2, 3))

    if failures:
        for msg in failures:
            print("MISMATCH " + msg)
    else:
        print("KERNEL_OK")
</pallas_src>

<mosaic_0001>
module attributes {stable_mosaic.version = 11 : i64} {
  func.func @kernel(%arg0: i32, %arg1: memref<1xi32, #tpu.memory_space<smem>>, %arg2: memref<1xi32, #tpu.memory_space<smem>>, %arg3: memref<256x256xf32, #tpu.memory_space<vmem>>, %arg4: memref<256x256xf32, #tpu.memory_space<vmem>>, %arg5: memref<256x256xf32, #tpu.memory_space<any>>, %arg6: memref<256x256xf32, #tpu.memory_space<vmem>>, %arg7: memref<256x256xf32, #tpu.memory_space<vmem>>, %arg8: memref<2x!tpu.dma_semaphore, #tpu.memory_space<semaphore_mem>>) attributes {dimension_semantics = [#tpu.dimension_semantics<parallel>], iteration_bounds = array<i64: 1>, scalar_prefetch = 2 : i64, scratch_operands = 3 : i64, tpu.core_type = #tpu.core_type<tc>, window_params = [{transform_indices = @transform_0, window_bounds = array<i64: 256, 256>}, {transform_indices = @transform_1, window_bounds = array<i64: 256, 256>}, {}]} {
    %0 = arith.index_cast %arg0 : i32 to index
    %1 = memref.load %arg1[%0] : memref<1xi32, #tpu.memory_space<smem>>
    %2 = arith.index_cast %arg0 : i32 to index
    %3 = memref.load %arg2[%2] : memref<1xi32, #tpu.memory_space<smem>>
    %c0 = arith.constant 0 : index
    %c0_0 = arith.constant 0 : index
    %4 = vector.load %arg3[%c0, %c0_0] : memref<256x256xf32, #tpu.memory_space<vmem>>, vector<256x256xf32>
    %c0_1 = arith.constant 0 : index
    %c0_2 = arith.constant 0 : index
    %5 = vector.load %arg4[%c0_1, %c0_2] : memref<256x256xf32, #tpu.memory_space<vmem>>, vector<256x256xf32>
    %6 = tpu.transpose %5, [1, 0] : vector<256x256xf32> -> vector<256x256xf32>
    %7 = arith.addf %4, %6 : vector<256x256xf32>
    %cst = arith.constant 2.000000e+00 : f32
    %8 = vector.broadcast %cst : f32 to vector<256x256xf32>
    %9 = arith.divf %7, %8 : vector<256x256xf32>
    %c0_3 = arith.constant 0 : index
    %c0_4 = arith.constant 0 : index
    %10 = vector.load %arg6[%c0_3, %c0_4] : memref<256x256xf32, #tpu.memory_space<vmem>>, vector<256x256xf32>
    tpu.vector_store %arg6[%c0_3, %c0_4], %9 {strides = array<i32>} : memref<256x256xf32, #tpu.memory_space<vmem>>, vector<256x256xf32>,
    %11 = tpu.transpose %9, [1, 0] : vector<256x256xf32> -> vector<256x256xf32>
    %c0_5 = arith.constant 0 : index
    %c0_6 = arith.constant 0 : index
    %12 = vector.load %arg7[%c0_5, %c0_6] : memref<256x256xf32, #tpu.memory_space<vmem>>, vector<256x256xf32>
    tpu.vector_store %arg7[%c0_5, %c0_6], %11 {strides = array<i32>} : memref<256x256xf32, #tpu.memory_space<vmem>>, vector<256x256xf32>,
    %c256_i32 = arith.constant 256 : i32
    %13 = arith.muli %1, %c256_i32 : i32
    %c256_i32_7 = arith.constant 256 : i32
    %14 = arith.muli %3, %c256_i32_7 : i32
    %15 = arith.cmpi ne, %1, %3 : i32
    %c0_i32 = arith.constant 0 : i32
    %c0_i32_8 = arith.constant 0 : i32
    %c0_i32_9 = arith.constant 0 : i32
    %16 = tpu.memref_slice %arg6[%c0_i32_8, %c0_i32_9] : memref<256x256xf32, #tpu.memory_space<vmem>> -> memref<256x256xf32, #tpu.memory_space<vmem>>
    %17 = tpu.memref_slice %arg5[%13, %14] : memref<256x256xf32, #tpu.memory_space<any>> -> memref<256x256xf32, #tpu.memory_space<any>>
    %18 = tpu.memref_slice %arg8[%c0_i32] : memref<2x!tpu.dma_semaphore, #tpu.memory_space<semaphore_mem>> -> memref<1x!tpu.dma_semaphore, #tpu.memory_space<semaphore_mem>>
    %19 = tpu.memref_squeeze %18 : memref<1x!tpu.dma_semaphore, #tpu.memory_space<semaphore_mem>> -> memref<!tpu.dma_semaphore, #tpu.memory_space<semaphore_mem>>
    tpu.enqueue_dma source(%16 : memref<256x256xf32, #tpu.memory_space<vmem>>) target(%17 : memref<256x256xf32, #tpu.memory_space<any>>) target_semaphore(%19 : memref<!tpu.dma_semaphore, #tpu.memory_space<semaphore_mem>>)
    %20 = arith.extui %15 : i1 to i32
    %c0_i32_10 = arith.constant 0 : i32
    %21 = arith.cmpi ne, %20, %c0_i32_10 : i32
    scf.if %21 {
      %c1_i32 = arith.constant 1 : i32
      %c0_i32_15 = arith.constant 0 : i32
      %c0_i32_16 = arith.constant 0 : i32
      %28 = tpu.memref_slice %arg7[%c0_i32_15, %c0_i32_16] : memref<256x256xf32, #tpu.memory_space<vmem>> -> memref<256x256xf32, #tpu.memory_space<vmem>>
      %29 = tpu.memref_slice %arg5[%14, %13] : memref<256x256xf32, #tpu.memory_space<any>> -> memref<256x256xf32, #tpu.memory_space<any>>
      %30 = tpu.memref_slice %arg8[%c1_i32] : memref<2x!tpu.dma_semaphore, #tpu.memory_space<semaphore_mem>> -> memref<1x!tpu.dma_semaphore, #tpu.memory_space<semaphore_mem>>
      %31 = tpu.memref_squeeze %30 : memref<1x!tpu.dma_semaphore, #tpu.memory_space<semaphore_mem>> -> memref<!tpu.dma_semaphore, #tpu.memory_space<semaphore_mem>>
      tpu.enqueue_dma source(%28 : memref<256x256xf32, #tpu.memory_space<vmem>>) target(%29 : memref<256x256xf32, #tpu.memory_space<any>>) target_semaphore(%31 : memref<!tpu.dma_semaphore, #tpu.memory_space<semaphore_mem>>)
    } else {
    }
    %c0_i32_11 = arith.constant 0 : i32
    %c0_i32_12 = arith.constant 0 : i32
    %c0_i32_13 = arith.constant 0 : i32
    %22 = tpu.memref_slice %arg6[%c0_i32_12, %c0_i32_13] : memref<256x256xf32, #tpu.memory_space<vmem>> -> memref<256x256xf32, #tpu.memory_space<vmem>>
    %23 = tpu.memref_slice %arg5[%13, %14] : memref<256x256xf32, #tpu.memory_space<any>> -> memref<256x256xf32, #tpu.memory_space<any>>
    %24 = tpu.memref_slice %arg8[%c0_i32_11] : memref<2x!tpu.dma_semaphore, #tpu.memory_space<semaphore_mem>> -> memref<1x!tpu.dma_semaphore, #tpu.memory_space<semaphore_mem>>
    %25 = tpu.memref_squeeze %24 : memref<1x!tpu.dma_semaphore, #tpu.memory_space<semaphore_mem>> -> memref<!tpu.dma_semaphore, #tpu.memory_space<semaphore_mem>>
    tpu.wait_dma2 semaphore(%25 : memref<!tpu.dma_semaphore, #tpu.memory_space<semaphore_mem>>) src(%22 : memref<256x256xf32, #tpu.memory_space<vmem>>) dst(%23 : memref<256x256xf32, #tpu.memory_space<any>>)
    %26 = arith.extui %15 : i1 to i32
    %c0_i32_14 = arith.constant 0 : i32
    %27 = arith.cmpi ne, %26, %c0_i32_14 : i32
    scf.if %27 {
      %c1_i32 = arith.constant 1 : i32
      %c0_i32_15 = arith.constant 0 : i32
      %c0_i32_16 = arith.constant 0 : i32
      %28 = tpu.memref_slice %arg7[%c0_i32_15, %c0_i32_16] : memref<256x256xf32, #tpu.memory_space<vmem>> -> memref<256x256xf32, #tpu.memory_space<vmem>>
      %29 = tpu.memref_slice %arg5[%14, %13] : memref<256x256xf32, #tpu.memory_space<any>> -> memref<256x256xf32, #tpu.memory_space<any>>
      %30 = tpu.memref_slice %arg8[%c1_i32] : memref<2x!tpu.dma_semaphore, #tpu.memory_space<semaphore_mem>> -> memref<1x!tpu.dma_semaphore, #tpu.memory_space<semaphore_mem>>
      %31 = tpu.memref_squeeze %30 : memref<1x!tpu.dma_semaphore, #tpu.memory_space<semaphore_mem>> -> memref<!tpu.dma_semaphore, #tpu.memory_space<semaphore_mem>>
      tpu.wait_dma2 semaphore(%31 : memref<!tpu.dma_semaphore, #tpu.memory_space<semaphore_mem>>) src(%28 : memref<256x256xf32, #tpu.memory_space<vmem>>) dst(%29 : memref<256x256xf32, #tpu.memory_space<any>>)
    } else {
    }
    return
  }
  func.func @transform_0(%arg0: i32, %arg1: memref<1xi32, #tpu.memory_space<smem>>, %arg2: memref<1xi32, #tpu.memory_space<smem>>) -> (i32, i32) {
    %0 = arith.index_cast %arg0 : i32 to index
    %1 = memref.load %arg1[%0] : memref<1xi32, #tpu.memory_space<smem>>
    %2 = arith.index_cast %arg0 : i32 to index
    %3 = memref.load %arg2[%2] : memref<1xi32, #tpu.memory_space<smem>>
    %c0_i32 = arith.constant 0 : i32
    return %1, %3 : i32, i32
  }
  func.func @transform_1(%arg0: i32, %arg1: memref<1xi32, #tpu.memory_space<smem>>, %arg2: memref<1xi32, #tpu.memory_space<smem>>) -> (i32, i32) {
    %0 = arith.index_cast %arg0 : i32 to index
    %1 = memref.load %arg2[%0] : memref<1xi32, #tpu.memory_space<smem>>
    %2 = arith.index_cast %arg0 : i32 to index
    %3 = memref.load %arg1[%2] : memref<1xi32, #tpu.memory_space<smem>>
    %c0_i32 = arith.constant 0 : i32
    return %1, %3 : i32, i32
  }
}

</mosaic_0001>

<bundles_post_ra>
// kernel: tpu_custom_call.1
= control target key start
LH: loop header
LB: loop body
LE: loop exit
PB: predicated region body
PF: predicated region fallthrough
CT: control target
= control target key end

     0   :  { %11 = vsyncpa [#allocation9], 0  ;;  %s1191_s0 = inlined_call_operand.<no memory space> [shape: s32[1], index: 0, kind: input, shape index: {}]   ;;  %s1192_s1 = inlined_call_operand.<no memory space> [shape: s32[1], index: 1, kind: input, shape index: {}]   ;;  %s1193_s2 = inlined_call_operand.hbm [shape: f32[256,256], index: 2, kind: input, shape index: {}]   ;;  %s1194_s3 = inlined_call_operand.hbm [shape: f32[256,256], index: 3, kind: input, shape index: {}]   ;;  %s1195_s4 = inlined_call_operand.hbm [shape: f32[256,256], index: 4, kind: output, shape index: {}]  }
   0x1   :  { %s799_s17 = sshll.u32 %s1192_s1, 1  ;;  %s816_s20 = sshll.u32 %s1191_s0, 6 }
   0x2   :  { %12 = vsyncpa [#allocation11], 0  ;;  %s23_s21 = sadd.s32 %s816_s20, %s799_s17  ;;  %s940_s23 = smov [#allocation8]  }
   0x3   :  { %s801_s22 = sshll.u32 %s23_s21, 7  ;;  %s26_s24 = sshll.u32 %s940_s23, 4  ;;  %s27_s24 = int_to_ptr.vmem [resolvable:$true] %s26_s24 }
   0x4   :  { %s25_s27 = scalar_lea.hbm %s1193_s2, %s801_s22  ;;  %s832_s5 = scalar_lea.hbm %s1193_s2, 8192 }
   0x5   :  { %s830_s28 = scalar_lea.hbm %s25_s27, 8192  ;;  %p833_p1 = scmp.lt.u32.totalorder %s25_s27, %s1193_s2 }
   0x6   :  { %p831_p0 = scmp.ne.s32.totalorder %s25_s27, %s830_s28  ;;  %p834_p2 = scmp.lt.u32.totalorder %s832_s5, %s830_s28 }
   0x7   :  { %p836_p4 = scmp.lt.u32.totalorder %s830_s28, %s25_s27 }
   0x8   :  { %p835_p3 = por %p834_p2, %p833_p1 }
   0xa   :  { %p837_p5 = por %p836_p4, %p835_p3 }
   0xc   :  { %p838_p6 = pnand %p837_p5, %p831_p0 }
   0xe   :  { %841 = shalt.err (!%p838_p6)
}
   0xf   :  { %s842_s8 = scalar_lea.vmem %s27_s24, 8192  ;;  %p847_p8 = scmp.lt.s32.totalorder %s27_s24, %s27_s24 }
  0x10   :  { %p843_p7 = scmp.ne.s32.totalorder %s27_s24, %s842_s8  ;;  %p848_p9 = scmp.lt.s32.totalorder %s842_s8, %s842_s8 }
  0x12   :  { %p849_p10 = por %p848_p9, %p847_p8 }
  0x14   :  { %p850_p11 = pnand %p849_p10, %p843_p7 }
  0x16   :  { %853 = shalt.err (!%p850_p11)
}
  0x17   :  { %s941_s9 = smov 256   ;;  %s942_s10 = smov 16  }
  0x18   :  { %32 = dma.hbm_to_vmem [thread:$0]  %s25_s27, 8192, %s27_s24, [#allocation9], %s941_s9, %s941_s9, %s942_s10  }
  0x19   :  { %s803_s12 = sshll.u32 %s1191_s0, 1  ;;  %s817_s15 = sshll.u32 %s1192_s1, 6 }
  0x1a   :  { %s43_s16 = sadd.s32 %s817_s15, %s803_s12  ;;  %s943_s18 = smov [#allocation10]  }
  0x1b   :  { %s805_s17 = sshll.u32 %s43_s16, 7  ;;  %s46_s19 = sshll.u32 %s943_s18, 4  ;;  %s47_s19 = int_to_ptr.vmem [resolvable:$true] %s46_s19 }
  0x1c   :  { %s45_s22 = scalar_lea.hbm %s1194_s3, %s805_s17  ;;  %s856_s26 = scalar_lea.hbm %s1194_s3, 8192 }
  0x1d   :  { %s854_s23 = scalar_lea.hbm %s45_s22, 8192  ;;  %p857_p13 = scmp.lt.u32.totalorder %s45_s22, %s1194_s3 }
  0x1e   :  { %p855_p12 = scmp.ne.s32.totalorder %s45_s22, %s854_s23  ;;  %p858_p0 = scmp.lt.u32.totalorder %s856_s26, %s854_s23 }
  0x1f   :  { %p860_p2 = scmp.lt.u32.totalorder %s854_s23, %s45_s22 }
  0x20   :  { %p859_p1 = por %p858_p0, %p857_p13 }
  0x22   :  { %p861_p3 = por %p860_p2, %p859_p1 }
  0x24   :  { %p862_p4 = pnand %p861_p3, %p855_p12 }
  0x26   :  { %865 = shalt.err (!%p862_p4)
}
  0x27   :  { %s866_s29 = scalar_lea.vmem %s47_s19, 8192  ;;  %p871_p6 = scmp.lt.s32.totalorder %s47_s19, %s47_s19 }
  0x28   :  { %p867_p5 = scmp.ne.s32.totalorder %s47_s19, %s866_s29  ;;  %p872_p7 = scmp.lt.s32.totalorder %s866_s29, %s866_s29 }
  0x2a   :  { %p873_p8 = por %p872_p7, %p871_p6 }
  0x2c   :  { %p874_p9 = pnand %p873_p8, %p867_p5 }
  0x2e   :  { %877 = shalt.err (!%p874_p9)
}
  0x2f   :  { %52 = dma.hbm_to_vmem [thread:$0]  %s45_s22, 8192, %s47_s19, [#allocation11], %s941_s9, %s941_s9, %s942_s10  }
  0x30   :  { %930 = dma.done.wait [#allocation9], 8192  }
  0x31   :  { %931 = vsyncadd [#allocation9], 4294959104 }
  0x32   :  { %932 = dma.done.wait [#allocation11], 8192  }
  0x33   :  { %933 = vsyncadd [#allocation11], 4294959104  ;;  %v133_v0 = vld [vmem:[#allocation10] sm:$0xff]  ;;  %v135_v1 = vld [vmem:[#allocation10 + $0x10] sm:$0xff]  ;;  %s806_s5 = sshll.u32 %s1191_s0, 8  ;;  %s807_s8 = sshll.u32 %s1192_s1, 8 }
  0x34   :  { %197 = vxpose.xlu0.b32.start [1/16] %v133_v0, 128  ;;  %v134_v2 = vld [vmem:[#allocation10 + $0x8] sm:$0xff]  ;;  %v137_v3 = vld [vmem:[#allocation10 + $0x20] sm:$0xff]  ;;  %v136_v4 = vld [vmem:[#allocation10 + $0x18] sm:$0xff]  ;;  %s715_s2 = sshra.s32 %s806_s5, 3  ;;  %s713_s13 = sshra.s32 %s807_s8, 7 }
  0x35   :  { %229 = vxpose.xlu1.b32.start [1/16] %v134_v2, 128  ;;  %v139_v5 = vld [vmem:[#allocation10 + $0x30] sm:$0xff]  ;;  %v138_v6 = vld [vmem:[#allocation10 + $0x28] sm:$0xff]  ;;  %v141_v7 = vld [vmem:[#allocation10 + $0x40] sm:$0xff]  ;;  %s808_s14 = sshll.u32 %s715_s2, 1  ;;  %s944_s17 = smov [#allocation2]  }
  0x36   :  { %v140_v8 = vld [vmem:[#allocation10 + $0x38] sm:$0xff]  ;;  %v143_v9 = vld [vmem:[#allocation10 + $0x50] sm:$0xff]  ;;  %v142_v10 = vld [vmem:[#allocation10 + $0x48] sm:$0xff]  ;;  %s718_s15 = sadd.s32 %s808_s14, %s713_s13  ;;  %s728_s18 = sshll.u32 %s944_s17, 4  ;;  %s729_s18 = int_to_ptr.vmem [resolvable:$true] %s728_s18 }
  0x37   :  { %v145_v11 = vld [vmem:[#allocation10 + $0x60] sm:$0xff]  ;;  %v144_v12 = vld [vmem:[#allocation10 + $0x58] sm:$0xff]  ;;  %v147_v13 = vld [vmem:[#allocation10 + $0x70] sm:$0xff]  ;;  %s809_s16 = sshll.u32 %s718_s15, 7  ;;  %s878_s22 = scalar_lea.vmem %s729_s18, 8192 }
  0x38   :  { %198 = vxpose.xlu0.b32.cont [2/16] %v135_v1, 128  ;;  %v146_v14 = vld [vmem:[#allocation10 + $0x68] sm:$0xff]  ;;  %v149_v15 = vld [vmem:[#allocation10 + $0x80] sm:$0xff]  ;;  %v148_v16 = vld [vmem:[#allocation10 + $0x78] sm:$0xff]  ;;  %s720_s21 = scalar_lea.hbm %s1195_s4, %s809_s16  ;;  %p879_p10 = scmp.ne.s32.totalorder %s729_s18, %s878_s22 }
  0x39   :  { %230 = vxpose.xlu1.b32.cont [2/16] %v136_v4, 128  ;;  %v151_v17 = vld [vmem:[#allocation10 + $0x90] sm:$0xff]  ;;  %v150_v18 = vld [vmem:[#allocation10 + $0x88] sm:$0xff]  ;;  %v153_v19 = vld [vmem:[#allocation10 + $0xa0] sm:$0xff]  ;;  %p883_p11 = scmp.lt.s32.totalorder %s729_s18, %s729_s18  ;;  %p884_p12 = scmp.lt.s32.totalorder %s878_s22, %s878_s22 }
  0x3a   :  { %v152_v20 = vld [vmem:[#allocation10 + $0x98] sm:$0xff]  ;;  %v155_v21 = vld [vmem:[#allocation10 + $0xb0] sm:$0xff]  ;;  %v154_v22 = vld [vmem:[#allocation10 + $0xa8] sm:$0xff] }
  0x3b   :  { %v157_v23 = vld [vmem:[#allocation10 + $0xc0] sm:$0xff]  ;;  %v156_v24 = vld [vmem:[#allocation10 + $0xb8] sm:$0xff]  ;;  %v159_v25 = vld [vmem:[#allocation10 + $0xd0] sm:$0xff]  ;;  %p885_p13 = por %p884_p12, %p883_p11 }
  0x3c   :  { %199 = vxpose.xlu0.b32.cont [3/16] %v137_v3, 128  ;;  %v158_v26 = vld [vmem:[#allocation10 + $0xc8] sm:$0xff]  ;;  %v161_v27 = vld [vmem:[#allocation10 + $0xe0] sm:$0xff]  ;;  %v160_v28 = vld [vmem:[#allocation10 + $0xd8] sm:$0xff] }
  0x3d   :  { %231 = vxpose.xlu1.b32.cont [3/16] %v138_v6, 128  ;;  %v163_v29 = vld [vmem:[#allocation10 + $0xf0] sm:$0xff]  ;;  %v162_v30 = vld [vmem:[#allocation10 + $0xe8] sm:$0xff]  ;;  %v165_v31 = vld [vmem:[#allocation10 + $0x100] sm:$0xff]  ;;  %p886_p0 = pnand %p885_p13, %p879_p10 }
  0x3e   :  { %v164_v32 = vld [vmem:[#allocation10 + $0xf8] sm:$0xff]  ;;  %v167_v33 = vld [vmem:[#allocation10 + $0x110] sm:$0xff]  ;;  %v166_v34 = vld [vmem:[#allocation10 + $0x108] sm:$0xff] }
  0x3f   :  { %v169_v35 = vld [vmem:[#allocation10 + $0x120] sm:$0xff]  ;;  %v168_v36 = vld [vmem:[#allocation10 + $0x118] sm:$0xff]  ;;  %v171_v37 = vld [vmem:[#allocation10 + $0x130] sm:$0xff] }
  0x40   :  { %200 = vxpose.xlu0.b32.cont [4/16] %v139_v5, 128  ;;  %v170_v38 = vld [vmem:[#allocation10 + $0x128] sm:$0xff]  ;;  %v173_v39 = vld [vmem:[#allocation10 + $0x140] sm:$0xff]  ;;  %v172_v40 = vld [vmem:[#allocation10 + $0x138] sm:$0xff] }
  0x41   :  { %232 = vxpose.xlu1.b32.cont [4/16] %v140_v8, 128  ;;  %v175_v41 = vld [vmem:[#allocation10 + $0x150] sm:$0xff]  ;;  %v174_v42 = vld [vmem:[#allocation10 + $0x148] sm:$0xff]  ;;  %v177_v43 = vld [vmem:[#allocation10 + $0x160] sm:$0xff] }
  0x42   :  { %v176_v44 = vld [vmem:[#allocation10 + $0x158] sm:$0xff]  ;;  %v179_v45 = vld [vmem:[#allocation10 + $0x170] sm:$0xff]  ;;  %v178_v46 = vld [vmem:[#allocation10 + $0x168] sm:$0xff] }
  0x43   :  { %v181_v47 = vld [vmem:[#allocation10 + $0x180] sm:$0xff]  ;;  %v180_v48 = vld [vmem:[#allocation10 + $0x178] sm:$0xff]  ;;  %v183_v49 = vld [vmem:[#allocation10 + $0x190] sm:$0xff] }
  0x44   :  { %201 = vxpose.xlu0.b32.cont [5/16] %v141_v7, 128  ;;  %v182_v50 = vld [vmem:[#allocation10 + $0x188] sm:$0xff]  ;;  %v185_v51 = vld [vmem:[#allocation10 + $0x1a0] sm:$0xff]  ;;  %v184_v52 = vld [vmem:[#allocation10 + $0x198] sm:$0xff] }
  0x45   :  { %233 = vxpose.xlu1.b32.cont [5/16] %v142_v10, 128  ;;  %v187_v53 = vld [vmem:[#allocation10 + $0x1b0] sm:$0xff]  ;;  %v186_v54 = vld [vmem:[#allocation10 + $0x1a8] sm:$0xff]  ;;  %v189_v55 = vld [vmem:[#allocation10 + $0x1c0] sm:$0xff] }
  0x46   :  { %v188_v56 = vld [vmem:[#allocation10 + $0x1b8] sm:$0xff]  ;;  %v191_v57 = vld [vmem:[#allocation10 + $0x1d0] sm:$0xff]  ;;  %v190_v58 = vld [vmem:[#allocation10 + $0x1c8] sm:$0xff] }
  0x47   :  { %v193_v59 = vld [vmem:[#allocation10 + $0x1e0] sm:$0xff]  ;;  %v192_v60 = vld [vmem:[#allocation10 + $0x1d8] sm:$0xff]  ;;  %v195_v61 = vld [vmem:[#allocation10 + $0x1f0] sm:$0xff] }
  0x48   :  { %202 = vxpose.xlu0.b32.cont [6/16] %v143_v9, 128  ;;  %v194_v62 = vld [vmem:[#allocation10 + $0x1e8] sm:$0xff]  ;;  %v69_v63 = vld [vmem:[#allocation8] sm:$0xff]  ;;  %v196_v0 = vld [vmem:[#allocation10 + $0x1f8] sm:$0xff] }
  0x49   :  { %234 = vxpose.xlu1.b32.cont [6/16] %v144_v12, 128  ;;  %v71_v3 = vld [vmem:[#allocation8 + $0x10] sm:$0xff]  ;;  %v101_v5 = vld [vmem:[#allocation8 + $0x100] sm:$0xff] }
  0x4a   :  { %v73_v9 = vld [vmem:[#allocation8 + $0x20] sm:$0xff]  ;;  %v103_v12 = vld [vmem:[#allocation8 + $0x110] sm:$0xff] }
  0x4c   :  { %203 = vxpose.xlu0.b32.cont [7/16] %v145_v11, 128 }
  0x4d   :  { %235 = vxpose.xlu1.b32.cont [7/16] %v146_v14, 128 }
  0x50   :  { %204 = vxpose.xlu0.b32.cont [8/16] %v147_v13, 128 }
  0x51   :  { %236 = vxpose.xlu1.b32.cont [8/16] %v148_v16, 128 }
  0x54   :  { %205 = vxpose.xlu0.b32.cont [9/16] %v149_v15, 128 }
  0x55   :  { %237 = vxpose.xlu1.b32.cont [9/16] %v150_v18, 128 }
  0x58   :  { %206 = vxpose.xlu0.b32.cont [10/16] %v151_v17, 128  ;;  %v75_v17 = vld [vmem:[#allocation8 + $0x30] sm:$0xff] }
  0x59   :  { %238 = vxpose.xlu1.b32.cont [10/16] %v152_v20, 128  ;;  %v105_v20 = vld [vmem:[#allocation8 + $0x120] sm:$0xff] }
  0x5c   :  { %207 = vxpose.xlu0.b32.cont [11/16] %v153_v19, 128 }
  0x5d   :  { %239 = vxpose.xlu1.b32.cont [11/16] %v154_v22, 128 }
  0x60   :  { %208 = vxpose.xlu0.b32.cont [12/16] %v155_v21, 128 }
  0x61   :  { %240 = vxpose.xlu1.b32.cont [12/16] %v156_v24, 128 }
  0x64   :  { %209 = vxpose.xlu0.b32.cont [13/16] %v157_v23, 128 }
  0x65   :  { %241 = vxpose.xlu1.b32.cont [13/16] %v158_v26, 128 }
  0x68   :  { %210 = vxpose.xlu0.b32.cont [14/16] %v159_v25, 128  ;;  %v77_v25 = vld [vmem:[#allocation8 + $0x40] sm:$0xff] }
  0x69   :  { %242 = vxpose.xlu1.b32.cont [14/16] %v160_v28, 128  ;;  %v107_v28 = vld [vmem:[#allocation8 + $0x130] sm:$0xff] }
  0x6c   :  { %211 = vxpose.xlu0.b32.cont [15/16] %v161_v27, 128 }
  0x6d   :  { %243 = vxpose.xlu1.b32.cont [15/16] %v162_v30, 128 }
  0x70   :  { %212 = vxpose.xlu0.b32.end [16/16] %v163_v29, 128 }
  0x71   :  { %244 = vxpose.xlu1.b32.end [16/16] %v164_v32, 128 }
  0x74   :  { %261 = vxpose.xlu0.b32.start [1/16] %v165_v31, 128 }
  0x75   :  { %293 = vxpose.xlu1.b32.start [1/16] %v166_v34, 128 }
  0x78   :  { %262 = vxpose.xlu0.b32.cont [2/16] %v167_v33, 128  ;;  %v79_v33 = vld [vmem:[#allocation8 + $0x50] sm:$0xff] }
  0x79   :  { %294 = vxpose.xlu1.b32.cont [2/16] %v168_v36, 128  ;;  %v109_v36 = vld [vmem:[#allocation8 + $0x140] sm:$0xff] }
  0x7c   :  { %263 = vxpose.xlu0.b32.cont [3/16] %v169_v35, 128 }
  0x7d   :  { %295 = vxpose.xlu1.b32.cont [3/16] %v170_v38, 128 }
  0x80   :  { %264 = vxpose.xlu0.b32.cont [4/16] %v171_v37, 128 }
  0x81   :  { %296 = vxpose.xlu1.b32.cont [4/16] %v172_v40, 128 }
  0x84   :  { %265 = vxpose.xlu0.b32.cont [5/16] %v173_v39, 128 }
  0x85   :  { %297 = vxpose.xlu1.b32.cont [5/16] %v174_v42, 128 }
  0x88   :  { %266 = vxpose.xlu0.b32.cont [6/16] %v175_v41, 128  ;;  %v81_v41 = vld [vmem:[#allocation8 + $0x60] sm:$0xff] }
  0x89   :  { %298 = vxpose.xlu1.b32.cont [6/16] %v176_v44, 128  ;;  %v111_v44 = vld [vmem:[#allocation8 + $0x150] sm:$0xff] }
  0x8c   :  { %267 = vxpose.xlu0.b32.cont [7/16] %v177_v43, 128 }
  0x8d   :  { %299 = vxpose.xlu1.b32.cont [7/16] %v178_v46, 128 }
  0x90   :  { %268 = vxpose.xlu0.b32.cont [8/16] %v179_v45, 128 }
  0x91   :  { %300 = vxpose.xlu1.b32.cont [8/16] %v180_v48, 128 }
  0x94   :  { %269 = vxpose.xlu0.b32.cont [9/16] %v181_v47, 128 }
  0x95   :  { %301 = vxpose.xlu1.b32.cont [9/16] %v182_v50, 128 }
  0x98   :  { %270 = vxpose.xlu0.b32.cont [10/16] %v183_v49, 128  ;;  %v83_v49 = vld [vmem:[#allocation8 + $0x70] sm:$0xff] }
  0x99   :  { %302 = vxpose.xlu1.b32.cont [10/16] %v184_v52, 128  ;;  %v113_v52 = vld [vmem:[#allocation8 + $0x160] sm:$0xff] }
  0x9c   :  { %271 = vxpose.xlu0.b32.cont [11/16] %v185_v51, 128 }
  0x9d   :  { %303 = vxpose.xlu1.b32.cont [11/16] %v186_v54, 128 }
  0xa0   :  { %272 = vxpose.xlu0.b32.cont [12/16] %v187_v53, 128 }
  0xa1   :  { %304 = vxpose.xlu1.b32.cont [12/16] %v188_v56, 128 }
  0xa4   :  { %273 = vxpose.xlu0.b32.cont [13/16] %v189_v55, 128 }
  0xa5   :  { %305 = vxpose.xlu1.b32.cont [13/16] %v190_v58, 128 }
  0xa8   :  { %274 = vxpose.xlu0.b32.cont [14/16] %v191_v57, 128  ;;  %v85_v57 = vld [vmem:[#allocation8 + $0x80] sm:$0xff] }
  0xa9   :  { %306 = vxpose.xlu1.b32.cont [14/16] %v192_v60, 128  ;;  %v115_v60 = vld [vmem:[#allocation8 + $0x170] sm:$0xff] }
  0xac   :  { %275 = vxpose.xlu0.b32.cont [15/16] %v193_v59, 128 }
  0xad   :  { %307 = vxpose.xlu1.b32.cont [15/16] %v194_v62, 128 }
  0xb0   :  { %276 = vxpose.xlu0.b32.end [16/16] %v195_v61, 128 }
  0xb1   :  { %308 = vxpose.xlu1.b32.end [16/16] %v196_v0, 128 }
  0xb4   :  { %v213_v1 = vpop.trf.xlu0 }
  0xb5   :  { %v325_v2 = vadd.f32 %v213_v1, %v69_v63  ;;  %v245_v8 = vpop.trf.xlu1  ;;  %v87_v1 = vld [vmem:[#allocation8 + $0x90] sm:$0xff] }
  0xb6   :  { %v357_v10 = vadd.f32 %v245_v8, %v101_v5 }
  0xb7   :  { %v390_v4 = vmul.f32 0.5, %v325_v2 }
  0xb8   :  { %v214_v6 = vpop.trf.xlu0  ;;  %v1007_v14 = vmul.f32 0.5, %v357_v10 }
  0xb9   :  { %454 = vst [vmem:[#allocation2] sm:$0xff] %v390_v4  ;;  %v327_v7 = vadd.f32 %v214_v6, %v71_v3  ;;  %518 = vxpose.xlu0.b32.start [1/16] %v390_v4, 128  ;;  %v246_v16 = vpop.trf.xlu1  ;;  %v117_v4 = vld [vmem:[#allocation8 + $0x180] sm:$0xff] }
  0xba   :  { %486 = vst [vmem:[#allocation2 + $0x100] sm:$0xff] %v1007_v14  ;;  %v359_v18 = vadd.f32 %v246_v16, %v103_v12  ;;  %v119_v12 = vld [vmem:[#allocation8 + $0x190] sm:$0xff] }
  0xbb   :  { %v392_v11 = vmul.f32 0.5, %v327_v7 }
  0xbc   :  { %v215_v13 = vpop.trf.xlu0  ;;  %v1010_v22 = vmul.f32 0.5, %v359_v18  ;;  %v91_v18 = vld [vmem:[#allocation8 + $0xb0] sm:$0xff] }
  0xbd   :  { %456 = vst [vmem:[#allocation2 + $0x10] sm:$0xff] %v392_v11  ;;  %v329_v15 = vadd.f32 %v215_v13, %v73_v9  ;;  %519 = vxpose.xlu0.b32.cont [2/16] %v392_v11, 128  ;;  %v247_v24 = vpop.trf.xlu1  ;;  %v89_v9 = vld [vmem:[#allocation8 + $0xa0] sm:$0xff] }
  0xbe   :  { %488 = vst [vmem:[#allocation2 + $0x110] sm:$0xff] %v1010_v22  ;;  %v361_v26 = vadd.f32 %v247_v24, %v105_v20 }
  0xbf   :  { %v394_v19 = vmul.f32 0.5, %v329_v15 }
  0xc0   :  { %v216_v21 = vpop.trf.xlu0  ;;  %v1013_v30 = vmul.f32 0.5, %v361_v26 }
  0xc1   :  { %458 = vst [vmem:[#allocation2 + $0x20] sm:$0xff] %v394_v19  ;;  %v331_v23 = vadd.f32 %v216_v21, %v75_v17  ;;  %520 = vxpose.xlu0.b32.cont [3/16] %v394_v19, 128  ;;  %v248_v32 = vpop.trf.xlu1  ;;  %v121_v21 = vld [vmem:[#allocation8 + $0x1a0] sm:$0xff] }
  0xc2   :  { %490 = vst [vmem:[#allocation2 + $0x120] sm:$0xff] %v1013_v30  ;;  %v363_v34 = vadd.f32 %v248_v32, %v107_v28 }
  0xc3   :  { %v396_v27 = vmul.f32 0.5, %v331_v23 }
  0xc4   :  { %v217_v29 = vpop.trf.xlu0  ;;  %v1016_v38 = vmul.f32 0.5, %v363_v34 }
  0xc5   :  { %460 = vst [vmem:[#allocation2 + $0x30] sm:$0xff] %v396_v27  ;;  %v333_v31 = vadd.f32 %v217_v29, %v77_v25  ;;  %521 = vxpose.xlu0.b32.cont [4/16] %v396_v27, 128  ;;  %v249_v40 = vpop.trf.xlu1  ;;  %v93_v27 = vld [vmem:[#allocation8 + $0xc0] sm:$0xff] }
  0xc6   :  { %492 = vst [vmem:[#allocation2 + $0x130] sm:$0xff] %v1016_v38  ;;  %v365_v42 = vadd.f32 %v249_v40, %v109_v36  ;;  %v95_v36 = vld [vmem:[#allocation8 + $0xd0] sm:$0xff]  ;;  %v125_v40 = vld [vmem:[#allocation8 + $0x1c0] sm:$0xff] }
  0xc7   :  { %v398_v35 = vmul.f32 0.5, %v333_v31  ;;  %v123_v31 = vld [vmem:[#allocation8 + $0x1b0] sm:$0xff] }
  0xc8   :  { %v218_v37 = vpop.trf.xlu0  ;;  %v1019_v46 = vmul.f32 0.5, %v365_v42 }
  0xc9   :  { %462 = vst [vmem:[#allocation2 + $0x40] sm:$0xff] %v398_v35  ;;  %v335_v39 = vadd.f32 %v218_v37, %v79_v33  ;;  %522 = vxpose.xlu0.b32.cont [5/16] %v398_v35, 128  ;;  %v250_v48 = vpop.trf.xlu1 }
  0xca   :  { %494 = vst [vmem:[#allocation2 + $0x140] sm:$0xff] %v1019_v46  ;;  %v367_v50 = vadd.f32 %v250_v48, %v111_v44 }
  0xcb   :  { %v400_v43 = vmul.f32 0.5, %v335_v39 }
  0xcc   :  { %v219_v45 = vpop.trf.xlu0  ;;  %v1022_v54 = vmul.f32 0.5, %v367_v50 }
  0xcd   :  { %464 = vst [vmem:[#allocation2 + $0x50] sm:$0xff] %v400_v43  ;;  %v337_v47 = vadd.f32 %v219_v45, %v81_v41  ;;  %523 = vxpose.xlu0.b32.cont [6/16] %v400_v43, 128  ;;  %v251_v56 = vpop.trf.xlu1  ;;  %v97_v45 = vld [vmem:[#allocation8 + $0xe0] sm:$0xff] }
  0xce   :  { %496 = vst [vmem:[#allocation2 + $0x150] sm:$0xff] %v1022_v54  ;;  %v369_v58 = vadd.f32 %v251_v56, %v113_v52 }
  0xcf   :  { %v402_v51 = vmul.f32 0.5, %v337_v47 }
  0xd0   :  { %v220_v53 = vpop.trf.xlu0  ;;  %v1025_v62 = vmul.f32 0.5, %v369_v58  ;;  %v129_v58 = vld [vmem:[#allocation8 + $0x1e0] sm:$0xff] }
  0xd1   :  { %466 = vst [vmem:[#allocation2 + $0x60] sm:$0xff] %v402_v51  ;;  %v339_v55 = vadd.f32 %v220_v53, %v83_v49  ;;  %524 = vxpose.xlu0.b32.cont [7/16] %v402_v51, 128  ;;  %v252_v0 = vpop.trf.xlu1  ;;  %v127_v49 = vld [vmem:[#allocation8 + $0x1d0] sm:$0xff] }
  0xd2   :  { %498 = vst [vmem:[#allocation2 + $0x160] sm:$0xff] %v1025_v62  ;;  %v371_v2 = vadd.f32 %v252_v0, %v115_v60  ;;  %v70_v0 = vld [vmem:[#allocation8 + $0x8] sm:$0xff] }
  0xd3   :  { %v404_v59 = vmul.f32 0.5, %v339_v55  ;;  %v99_v55 = vld [vmem:[#allocation8 + $0xf0] sm:$0xff] }
  0xd4   :  { %v221_v61 = vpop.trf.xlu0  ;;  %v1028_v6 = vmul.f32 0.5, %v371_v2 }
  0xd5   :  { %468 = vst [vmem:[#allocation2 + $0x70] sm:$0xff] %v404_v59  ;;  %v341_v63 = vadd.f32 %v221_v61, %v85_v57  ;;  %525 = vxpose.xlu0.b32.cont [8/16] %v404_v59, 128  ;;  %v253_v8 = vpop.trf.xlu1 }
  0xd6   :  { %500 = vst [vmem:[#allocation2 + $0x170] sm:$0xff] %v1028_v6  ;;  %v373_v10 = vadd.f32 %v253_v8, %v117_v4 }
  0xd7   :  { %v406_v3 = vmul.f32 0.5, %v341_v63 }
  0xd8   :  { %v222_v5 = vpop.trf.xlu0  ;;  %v1031_v15 = vmul.f32 0.5, %v373_v10 }
  0xd9   :  { %470 = vst [vmem:[#allocation2 + $0x80] sm:$0xff] %v406_v3  ;;  %v343_v7 = vadd.f32 %v222_v5, %v87_v1  ;;  %526 = vxpose.xlu0.b32.cont [9/16] %v406_v3, 128  ;;  %v254_v17 = vpop.trf.xlu1  ;;  %v131_v3 = vld [vmem:[#allocation8 + $0x1f0] sm:$0xff] }
  0xda   :  { %502 = vst [vmem:[#allocation2 + $0x180] sm:$0xff] %v1031_v15  ;;  %v375_v19 = vadd.f32 %v254_v17, %v119_v12  ;;  %v102_v12 = vld [vmem:[#allocation8 + $0x108] sm:$0xff] }
  0xdb   :  { %v408_v11 = vmul.f32 0.5, %v343_v7 }
  0xdc   :  { %v223_v13 = vpop.trf.xlu0  ;;  %v1034_v24 = vmul.f32 0.5, %v375_v19  ;;  %v74_v19 = vld [vmem:[#allocation8 + $0x28] sm:$0xff] }
  0xdd   :  { %472 = vst [vmem:[#allocation2 + $0x90] sm:$0xff] %v408_v11  ;;  %v345_v16 = vadd.f32 %v223_v13, %v89_v9  ;;  %527 = vxpose.xlu0.b32.cont [10/16] %v408_v11, 128  ;;  %v255_v26 = vpop.trf.xlu1  ;;  %v72_v9 = vld [vmem:[#allocation8 + $0x18] sm:$0xff] }
  0xde   :  { %504 = vst [vmem:[#allocation2 + $0x190] sm:$0xff] %v1034_v24  ;;  %v377_v28 = vadd.f32 %v255_v26, %v121_v21 }
  0xdf   :  { %v410_v20 = vmul.f32 0.5, %v345_v16 }
  0xe0   :  { %v224_v23 = vpop.trf.xlu0  ;;  %v1037_v33 = vmul.f32 0.5, %v377_v28 }
  0xe1   :  { %474 = vst [vmem:[#allocation2 + $0xa0] sm:$0xff] %v410_v20  ;;  %v347_v25 = vadd.f32 %v224_v23, %v91_v18  ;;  %528 = vxpose.xlu0.b32.cont [11/16] %v410_v20, 128  ;;  %v256_v35 = vpop.trf.xlu1  ;;  %v104_v23 = vld [vmem:[#allocation8 + $0x118] sm:$0xff] }
  0xe2   :  { %506 = vst [vmem:[#allocation2 + $0x1a0] sm:$0xff] %v1037_v33  ;;  %v379_v37 = vadd.f32 %v256_v35, %v123_v31 }
  0xe3   :  { %v412_v29 = vmul.f32 0.5, %v347_v25 }
  0xe4   :  { %v225_v32 = vpop.trf.xlu0  ;;  %v1040_v42 = vmul.f32 0.5, %v379_v37 }
  0xe5   :  { %476 = vst [vmem:[#allocation2 + $0xb0] sm:$0xff] %v412_v29  ;;  %v349_v34 = vadd.f32 %v225_v32, %v93_v27  ;;  %529 = vxpose.xlu0.b32.cont [12/16] %v412_v29, 128  ;;  %v257_v44 = vpop.trf.xlu1  ;;  %v76_v29 = vld [vmem:[#allocation8 + $0x38] sm:$0xff]  ;;  %v106_v32 = vld [vmem:[#allocation8 + $0x128] sm:$0xff] }
  0xe6   :  { %508 = vst [vmem:[#allocation2 + $0x1b0] sm:$0xff] %v1040_v42  ;;  %v381_v47 = vadd.f32 %v257_v44, %v125_v40 }
  0xe7   :  { %v414_v39 = vmul.f32 0.5, %v349_v34 }
  0xe8   :  { %v226_v41 = vpop.trf.xlu0  ;;  %v1043_v51 = vmul.f32 0.5, %v381_v47 }
  0xe9   :  { %478 = vst [vmem:[#allocation2 + $0xc0] sm:$0xff] %v414_v39  ;;  %v351_v43 = vadd.f32 %v226_v41, %v95_v36  ;;  %530 = vxpose.xlu0.b32.cont [13/16] %v414_v39, 128  ;;  %v258_v53 = vpop.trf.xlu1  ;;  %v78_v39 = vld [vmem:[#allocation8 + $0x48] sm:$0xff]  ;;  %v108_v41 = vld [vmem:[#allocation8 + $0x138] sm:$0xff] }
  0xea   :  { %510 = vst [vmem:[#allocation2 + $0x1c0] sm:$0xff] %v1043_v51  ;;  %v383_v56 = vadd.f32 %v258_v53, %v127_v49 }
  0xeb   :  { %v416_v48 = vmul.f32 0.5, %v351_v43 }
  0xec   :  { %v227_v50 = vpop.trf.xlu0  ;;  %v1046_v60 = vmul.f32 0.5, %v383_v56 }
  0xed   :  { %480 = vst [vmem:[#allocation2 + $0xd0] sm:$0xff] %v416_v48  ;;  %v353_v52 = vadd.f32 %v227_v50, %v97_v45  ;;  %531 = vxpose.xlu0.b32.cont [14/16] %v416_v48, 128  ;;  %v259_v63 = vpop.trf.xlu1  ;;  %v80_v48 = vld [vmem:[#allocation8 + $0x58] sm:$0xff]  ;;  %v110_v50 = vld [vmem:[#allocation8 + $0x148] sm:$0xff] }
  0xee   :  { %512 = vst [vmem:[#allocation2 + $0x1d0] sm:$0xff] %v1046_v60  ;;  %v385_v1 = vadd.f32 %v259_v63, %v129_v58 }
  0xef   :  { %v418_v57 = vmul.f32 0.5, %v353_v52 }
  0xf0   :  { %v228_v59 = vpop.trf.xlu0  ;;  %v1049_v5 = vmul.f32 0.5, %v385_v1 }
  0xf1   :  { %482 = vst [vmem:[#allocation2 + $0xe0] sm:$0xff] %v418_v57  ;;  %v355_v61 = vadd.f32 %v228_v59, %v99_v55  ;;  %532 = vxpose.xlu0.b32.cont [15/16] %v418_v57, 128  ;;  %v260_v8 = vpop.trf.xlu1  ;;  %v82_v57 = vld [vmem:[#allocation8 + $0x68] sm:$0xff]  ;;  %v112_v59 = vld [vmem:[#allocation8 + $0x158] sm:$0xff] }
  0xf2   :  { %514 = vst [vmem:[#allocation2 + $0x1e0] sm:$0xff] %v1049_v5  ;;  %v387_v10 = vadd.f32 %v260_v8, %v131_v3 }
  0xf3   :  { %v420_v2 = vmul.f32 0.5, %v355_v61 }
  0xf4   :  { %v277_v4 = vpop.trf.xlu0  ;;  %v1052_v16 = vmul.f32 0.5, %v387_v10 }
  0xf5   :  { %484 = vst [vmem:[#allocation2 + $0xf0] sm:$0xff] %v420_v2  ;;  %v326_v7 = vadd.f32 %v277_v4, %v70_v0  ;;  %533 = vxpose.xlu0.b32.end [16/16] %v420_v2, 128  ;;  %v309_v18 = vpop.trf.xlu1  ;;  %v84_v2 = vld [vmem:[#allocation8 + $0x78] sm:$0xff]  ;;  %v114_v4 = vld [vmem:[#allocation8 + $0x168] sm:$0xff] }
  0xf6   :  { %516 = vst [vmem:[#allocation2 + $0x1f0] sm:$0xff] %v1052_v16  ;;  %v358_v20 = vadd.f32 %v309_v18, %v102_v12 }
  0xf7   :  { %v391_v11 = vmul.f32 0.5, %v326_v7 }
  0xf8   :  { %v278_v13 = vpop.trf.xlu0  ;;  %v1056_v26 = vmul.f32 0.5, %v358_v20 }
  0xf9   :  { %455 = vst [vmem:[#allocation2 + $0x8] sm:$0xff] %v391_v11  ;;  %v328_v17 = vadd.f32 %v278_v13, %v72_v9  ;;  %550 = vxpose.xlu1.b32.start [1/16] %v391_v11, 128  ;;  %582 = vxpose.xlu0.b32.start [1/16] %v1007_v14, 128  ;;  %v310_v28 = vpop.trf.xlu1  ;;  %v86_v11 = vld [vmem:[#allocation8 + $0x88] sm:$0xff]  ;;  %v116_v13 = vld [vmem:[#allocation8 + $0x178] sm:$0xff] }
  0xfa   :  { %487 = vst [vmem:[#allocation2 + $0x108] sm:$0xff] %v1056_v26  ;;  %v360_v14 = vadd.f32 %v310_v28, %v104_v23 }
  0xfb   :  { %v393_v21 = vmul.f32 0.5, %v328_v17 }
  0xfc   :  { %v279_v25 = vpop.trf.xlu0  ;;  %v1060_v35 = vmul.f32 0.5, %v360_v14 }
  0xfd   :  { %457 = vst [vmem:[#allocation2 + $0x18] sm:$0xff] %v393_v21  ;;  %v330_v27 = vadd.f32 %v279_v25, %v74_v19  ;;  %551 = vxpose.xlu1.b32.cont [2/16] %v393_v21, 128  ;;  %583 = vxpose.xlu0.b32.cont [2/16] %v1010_v22, 128  ;;  %v311_v37 = vpop.trf.xlu1  ;;  %v88_v21 = vld [vmem:[#allocation8 + $0x98] sm:$0xff]  ;;  %v118_v25 = vld [vmem:[#allocation8 + $0x188] sm:$0xff] }
  0xfe   :  { %489 = vst [vmem:[#allocation2 + $0x118] sm:$0xff] %v1060_v35  ;;  %v362_v22 = vadd.f32 %v311_v37, %v106_v32 }
  0xff   :  { %v395_v31 = vmul.f32 0.5, %v330_v27 }
 0x100   :  { %v280_v34 = vpop.trf.xlu0  ;;  %v1064_v44 = vmul.f32 0.5, %v362_v22 }
 0x101   :  { %459 = vst [vmem:[#allocation2 + $0x28] sm:$0xff] %v395_v31  ;;  %v332_v36 = vadd.f32 %v280_v34, %v76_v29  ;;  %552 = vxpose.xlu1.b32.cont [3/16] %v395_v31, 128  ;;  %584 = vxpose.xlu0.b32.cont [3/16] %v1013_v30, 128  ;;  %v312_v47 = vpop.trf.xlu1  ;;  %v90_v31 = vld [vmem:[#allocation8 + $0xa8] sm:$0xff]  ;;  %v120_v34 = vld [vmem:[#allocation8 + $0x198] sm:$0xff] }
 0x102   :  { %491 = vst [vmem:[#allocation2 + $0x128] sm:$0xff] %v1064_v44  ;;  %v364_v30 = vadd.f32 %v312_v47, %v108_v41 }
 0x103   :  { %v397_v40 = vmul.f32 0.5, %v332_v36 }
 0x104   :  { %v281_v43 = vpop.trf.xlu0  ;;  %v1068_v53 = vmul.f32 0.5, %v364_v30 }
 0x105   :  { %461 = vst [vmem:[#allocation2 + $0x38] sm:$0xff] %v397_v40  ;;  %v334_v45 = vadd.f32 %v281_v43, %v78_v39  ;;  %553 = vxpose.xlu1.b32.cont [4/16] %v397_v40, 128  ;;  %585 = vxpose.xlu0.b32.cont [4/16] %v1016_v38, 128  ;;  %v313_v56 = vpop.trf.xlu1  ;;  %v92_v40 = vld [vmem:[#allocation8 + $0xb8] sm:$0xff]  ;;  %v122_v43 = vld [vmem:[#allocation8 + $0x1a8] sm:$0xff] }
 0x106   :  { %493 = vst [vmem:[#allocation2 + $0x138] sm:$0xff] %v1068_v53  ;;  %v366_v38 = vadd.f32 %v313_v56, %v110_v50 }
 0x107   :  { %v399_v49 = vmul.f32 0.5, %v334_v45 }
 0x108   :  { %v282_v52 = vpop.trf.xlu0  ;;  %v1072_v63 = vmul.f32 0.5, %v366_v38 }
 0x109   :  { %463 = vst [vmem:[#allocation2 + $0x48] sm:$0xff] %v399_v49  ;;  %v336_v55 = vadd.f32 %v282_v52, %v80_v48  ;;  %554 = vxpose.xlu1.b32.cont [5/16] %v399_v49, 128  ;;  %586 = vxpose.xlu0.b32.cont [5/16] %v1019_v46, 128  ;;  %v314_v1 = vpop.trf.xlu1  ;;  %v94_v49 = vld [vmem:[#allocation8 + $0xc8] sm:$0xff]  ;;  %v124_v52 = vld [vmem:[#allocation8 + $0x1b8] sm:$0xff] }
 0x10a   :  { %495 = vst [vmem:[#allocation2 + $0x148] sm:$0xff] %v1072_v63  ;;  %v368_v46 = vadd.f32 %v314_v1, %v112_v59 }
 0x10b   :  { %v401_v58 = vmul.f32 0.5, %v336_v55 }
 0x10c   :  { %v283_v61 = vpop.trf.xlu0  ;;  %v1076_v8 = vmul.f32 0.5, %v368_v46 }
 0x10d   :  { %465 = vst [vmem:[#allocation2 + $0x58] sm:$0xff] %v401_v58  ;;  %v338_v0 = vadd.f32 %v283_v61, %v82_v57  ;;  %555 = vxpose.xlu1.b32.cont [6/16] %v401_v58, 128  ;;  %587 = vxpose.xlu0.b32.cont [6/16] %v1022_v54, 128  ;;  %v315_v10 = vpop.trf.xlu1  ;;  %v96_v58 = vld [vmem:[#allocation8 + $0xd8] sm:$0xff]  ;;  %v126_v61 = vld [vmem:[#allocation8 + $0x1c8] sm:$0xff] }
 0x10e   :  { %497 = vst [vmem:[#allocation2 + $0x158] sm:$0xff] %v1076_v8  ;;  %v370_v54 = vadd.f32 %v315_v10, %v114_v4 }
 0x10f   :  { %v403_v3 = vmul.f32 0.5, %v338_v0 }
 0x110   :  { %v284_v7 = vpop.trf.xlu0  ;;  %v1080_v18 = vmul.f32 0.5, %v370_v54 }
 0x111   :  { %467 = vst [vmem:[#allocation2 + $0x68] sm:$0xff] %v403_v3  ;;  %v340_v9 = vadd.f32 %v284_v7, %v84_v2  ;;  %556 = vxpose.xlu1.b32.cont [7/16] %v403_v3, 128  ;;  %588 = vxpose.xlu0.b32.cont [7/16] %v1025_v62, 128  ;;  %v316_v20 = vpop.trf.xlu1  ;;  %v98_v3 = vld [vmem:[#allocation8 + $0xe8] sm:$0xff]  ;;  %v128_v7 = vld [vmem:[#allocation8 + $0x1d8] sm:$0xff] }
 0x112   :  { %499 = vst [vmem:[#allocation2 + $0x168] sm:$0xff] %v1080_v18  ;;  %v372_v62 = vadd.f32 %v316_v20, %v116_v13 }
 0x113   :  { %v405_v12 = vmul.f32 0.5, %v340_v9 }
 0x114   :  { %v285_v17 = vpop.trf.xlu0  ;;  %v1084_v28 = vmul.f32 0.5, %v372_v62 }
 0x115   :  { %469 = vst [vmem:[#allocation2 + $0x78] sm:$0xff] %v405_v12  ;;  %v342_v19 = vadd.f32 %v285_v17, %v86_v11  ;;  %557 = vxpose.xlu1.b32.cont [8/16] %v405_v12, 128  ;;  %589 = vxpose.xlu0.b32.cont [8/16] %v1028_v6, 128  ;;  %v317_v14 = vpop.trf.xlu1  ;;  %v100_v12 = vld [vmem:[#allocation8 + $0xf8] sm:$0xff]  ;;  %v130_v17 = vld [vmem:[#allocation8 + $0x1e8] sm:$0xff] }
 0x116   :  { %501 = vst [vmem:[#allocation2 + $0x178] sm:$0xff] %v1084_v28  ;;  %v374_v6 = vadd.f32 %v317_v14, %v118_v25 }
 0x117   :  { %v407_v23 = vmul.f32 0.5, %v342_v19 }
 0x118   :  { %v286_v27 = vpop.trf.xlu0  ;;  %v1088_v37 = vmul.f32 0.5, %v374_v6 }
 0x119   :  { %471 = vst [vmem:[#allocation2 + $0x88] sm:$0xff] %v407_v23  ;;  %v344_v29 = vadd.f32 %v286_v27, %v88_v21  ;;  %558 = vxpose.xlu1.b32.cont [9/16] %v407_v23, 128  ;;  %590 = vxpose.xlu0.b32.cont [9/16] %v1031_v15, 128  ;;  %v318_v22 = vpop.trf.xlu1  ;;  %v132_v27 = vld [vmem:[#allocation8 + $0x1f8] sm:$0xff] }
 0x11a   :  { %503 = vst [vmem:[#allocation2 + $0x188] sm:$0xff] %v1088_v37  ;;  %v376_v15 = vadd.f32 %v318_v22, %v120_v34 }
 0x11b   :  { %v409_v32 = vmul.f32 0.5, %v344_v29 }
 0x11c   :  { %v287_v36 = vpop.trf.xlu0  ;;  %v1092_v47 = vmul.f32 0.5, %v376_v15 }
 0x11d   :  { %473 = vst [vmem:[#allocation2 + $0x98] sm:$0xff] %v409_v32  ;;  %v346_v39 = vadd.f32 %v287_v36, %v90_v31  ;;  %559 = vxpose.xlu1.b32.cont [10/16] %v409_v32, 128  ;;  %591 = vxpose.xlu0.b32.cont [10/16] %v1034_v24, 128  ;;  %v319_v30 = vpop.trf.xlu1 }
 0x11e   :  { %505 = vst [vmem:[#allocation2 + $0x198] sm:$0xff] %v1092_v47  ;;  %v378_v24 = vadd.f32 %v319_v30, %v122_v43 }
 0x11f   :  { %v411_v41 = vmul.f32 0.5, %v346_v39 }
 0x120   :  { %v288_v45 = vpop.trf.xlu0  ;;  %v1096_v56 = vmul.f32 0.5, %v378_v24 }
 0x121   :  { %475 = vst [vmem:[#allocation2 + $0xa8] sm:$0xff] %v411_v41  ;;  %v348_v48 = vadd.f32 %v288_v45, %v92_v40  ;;  %560 = vxpose.xlu1.b32.cont [11/16] %v411_v41, 128  ;;  %592 = vxpose.xlu0.b32.cont [11/16] %v1037_v33, 128  ;;  %v320_v38 = vpop.trf.xlu1 }
 0x122   :  { %507 = vst [vmem:[#allocation2 + $0x1a8] sm:$0xff] %v1096_v56  ;;  %v380_v33 = vadd.f32 %v320_v38, %v124_v52 }
 0x123   :  { %v413_v50 = vmul.f32 0.5, %v348_v48 }
 0x124   :  { %v289_v55 = vpop.trf.xlu0  ;;  %v1100_v1 = vmul.f32 0.5, %v380_v33 }
 0x125   :  { %477 = vst [vmem:[#allocation2 + $0xb8] sm:$0xff] %v413_v50  ;;  %v350_v57 = vadd.f32 %v289_v55, %v94_v49  ;;  %561 = vxpose.xlu1.b32.cont [12/16] %v413_v50, 128  ;;  %593 = vxpose.xlu0.b32.cont [12/16] %v1040_v42, 128  ;;  %v321_v46 = vpop.trf.xlu1 }
 0x126   :  { %509 = vst [vmem:[#allocation2 + $0x1b8] sm:$0xff] %v1100_v1  ;;  %v382_v42 = vadd.f32 %v321_v46, %v126_v61 }
 0x127   :  { %v415_v59 = vmul.f32 0.5, %v350_v57 }
 0x128   :  { %v290_v0 = vpop.trf.xlu0  ;;  %v1104_v10 = vmul.f32 0.5, %v382_v42 }
 0x129   :  { %479 = vst [vmem:[#allocation2 + $0xc8] sm:$0xff] %v415_v59  ;;  %v352_v2 = vadd.f32 %v290_v0, %v96_v58  ;;  %562 = vxpose.xlu1.b32.cont [13/16] %v415_v59, 128  ;;  %594 = vxpose.xlu0.b32.cont [13/16] %v1043_v51, 128  ;;  %v322_v54 = vpop.trf.xlu1 }
 0x12a   :  { %511 = vst [vmem:[#allocation2 + $0x1c8] sm:$0xff] %v1104_v10  ;;  %v384_v51 = vadd.f32 %v322_v54, %v128_v7 }
 0x12b   :  { %v417_v4 = vmul.f32 0.5, %v352_v2 }
 0x12c   :  { %v291_v9 = vpop.trf.xlu0  ;;  %v449_v20 = vmul.f32 0.5, %v384_v51 }
 0x12d   :  { %481 = vst [vmem:[#allocation2 + $0xd8] sm:$0xff] %v417_v4  ;;  %v354_v11 = vadd.f32 %v291_v9, %v98_v3  ;;  %563 = vxpose.xlu1.b32.cont [14/16] %v417_v4, 128  ;;  %595 = vxpose.xlu0.b32.cont [14/16] %v1046_v60, 128  ;;  %v323_v62 = vpop.trf.xlu1 }
 0x12e   :  { %513 = vst [vmem:[#allocation2 + $0x1d8] sm:$0xff] %v449_v20  ;;  %v386_v23 = vadd.f32 %v323_v62, %v130_v17 }
 0x12f   :  { %v419_v13 = vmul.f32 0.5, %v354_v11 }
 0x130   :  { %v292_v19 = vpop.trf.xlu0  ;;  %v451_v60 = vmul.f32 0.5, %v386_v23 }
 0x131   :  { %483 = vst [vmem:[#allocation2 + $0xe8] sm:$0xff] %v419_v13  ;;  %v356_v21 = vadd.f32 %v292_v19, %v100_v12  ;;  %564 = vxpose.xlu1.b32.cont [15/16] %v419_v13, 128  ;;  %596 = vxpose.xlu0.b32.cont [15/16] %v1049_v5, 128  ;;  %v324_v29 = vpop.trf.xlu1 }
 0x132   :  { %515 = vst [vmem:[#allocation2 + $0x1e8] sm:$0xff] %v451_v60  ;;  %v388_v14 = vadd.f32 %v324_v29, %v132_v27 }
 0x133   :  { %v421_v25 = vmul.f32 0.5, %v356_v21 }
 0x134   :  { %v453_v31 = vmul.f32 0.5, %v388_v14 }
 0x135   :  { %485 = vst [vmem:[#allocation2 + $0xf8] sm:$0xff] %v421_v25  ;;  %565 = vxpose.xlu1.b32.end [16/16] %v421_v25, 128  ;;  %597 = vxpose.xlu0.b32.end [16/16] %v1052_v16, 128 }
 0x136   :  { %517 = vst [vmem:[#allocation2 + $0x1f8] sm:$0xff] %v453_v31 }
 0x139   :  { %614 = vxpose.xlu1.b32.start [1/16] %v1056_v26, 128  ;;  %v534_v6 = vpop.trf.xlu0 }
 0x13a   :  { %646 = vst [vmem:[#allocation3] sm:$0xff] %v534_v6 }
 0x13d   :  { %615 = vxpose.xlu1.b32.cont [2/16] %v1060_v35, 128  ;;  %v535_v5 = vpop.trf.xlu0 }
 0x13e   :  { %648 = vst [vmem:[#allocation3 + $0x10] sm:$0xff] %v535_v5 }
 0x141   :  { %616 = vxpose.xlu1.b32.cont [3/16] %v1064_v44, 128  ;;  %v536_v32 = vpop.trf.xlu0 }
 0x142   :  { %650 = vst [vmem:[#allocation3 + $0x20] sm:$0xff] %v536_v32 }
 0x145   :  { %617 = vxpose.xlu1.b32.cont [4/16] %v1068_v53, 128  ;;  %v537_v16 = vpop.trf.xlu0 }
 0x146   :  { %652 = vst [vmem:[#allocation3 + $0x30] sm:$0xff] %v537_v16 }
 0x149   :  { %618 = vxpose.xlu1.b32.cont [5/16] %v1072_v63, 128  ;;  %v538_v34 = vpop.trf.xlu0 }
 0x14a   :  { %654 = vst [vmem:[#allocation3 + $0x40] sm:$0xff] %v538_v34 }
 0x14d   :  { %619 = vxpose.xlu1.b32.cont [6/16] %v1076_v8, 128  ;;  %v539_v26 = vpop.trf.xlu0 }
 0x14e   :  { %656 = vst [vmem:[#allocation3 + $0x50] sm:$0xff] %v539_v26 }
 0x151   :  { %620 = vxpose.xlu1.b32.cont [7/16] %v1080_v18, 128  ;;  %v540_v35 = vpop.trf.xlu0 }
 0x152   :  { %658 = vst [vmem:[#allocation3 + $0x60] sm:$0xff] %v540_v35 }
 0x155   :  { %621 = vxpose.xlu1.b32.cont [8/16] %v1084_v28, 128  ;;  %v541_v44 = vpop.trf.xlu0 }
 0x156   :  { %660 = vst [vmem:[#allocation3 + $0x70] sm:$0xff] %v541_v44 }
 0x159   :  { %622 = vxpose.xlu1.b32.cont [9/16] %v1088_v37, 128  ;;  %v542_v53 = vpop.trf.xlu0 }
 0x15a   :  { %662 = vst [vmem:[#allocation3 + $0x80] sm:$0xff] %v542_v53 }
 0x15d   :  { %623 = vxpose.xlu1.b32.cont [10/16] %v1092_v47, 128  ;;  %v543_v63 = vpop.trf.xlu0 }
 0x15e   :  { %664 = vst [vmem:[#allocation3 + $0x90] sm:$0xff] %v543_v63 }
 0x161   :  { %624 = vxpose.xlu1.b32.cont [11/16] %v1096_v56, 128  ;;  %v544_v8 = vpop.trf.xlu0 }
 0x162   :  { %666 = vst [vmem:[#allocation3 + $0xa0] sm:$0xff] %v544_v8 }
 0x165   :  { %625 = vxpose.xlu1.b32.cont [12/16] %v1100_v1, 128  ;;  %v545_v18 = vpop.trf.xlu0 }
 0x166   :  { %668 = vst [vmem:[#allocation3 + $0xb0] sm:$0xff] %v545_v18 }
 0x169   :  { %626 = vxpose.xlu1.b32.cont [13/16] %v1104_v10, 128  ;;  %v546_v28 = vpop.trf.xlu0 }
 0x16a   :  { %670 = vst [vmem:[#allocation3 + $0xc0] sm:$0xff] %v546_v28 }
 0x16d   :  { %627 = vxpose.xlu1.b32.cont [14/16] %v449_v20, 128  ;;  %v547_v36 = vpop.trf.xlu0 }
 0x16e   :  { %672 = vst [vmem:[#allocation3 + $0xd0] sm:$0xff] %v547_v36 }
 0x171   :  { %628 = vxpose.xlu1.b32.cont [15/16] %v451_v60, 128  ;;  %v548_v37 = vpop.trf.xlu0 }
 0x172   :  { %674 = vst [vmem:[#allocation3 + $0xe0] sm:$0xff] %v548_v37 }
 0x175   :  { %629 = vxpose.xlu1.b32.end [16/16] %v453_v31, 128  ;;  %v549_v39 = vpop.trf.xlu0 }
 0x176   :  { %676 = vst [vmem:[#allocation3 + $0xf0] sm:$0xff] %v549_v39 }
 0x177   :  { %889 = shalt.err (!%p886_p0)  }
 0x178   :  { %s890_s23 = scalar_lea.hbm %s720_s21, 8192  ;;  %s892_s26 = scalar_lea.hbm %s1195_s4, 8192 }
 0x179   :  { %p891_p1 = scmp.ne.s32.totalorder %s720_s21, %s890_s23  ;;  %p893_p2 = scmp.lt.u32.totalorder %s720_s21, %s1195_s4 }
 0x17a   :  { %p894_p3 = scmp.lt.u32.totalorder %s892_s26, %s890_s23  ;;  %p896_p5 = scmp.lt.u32.totalorder %s890_s23, %s720_s21 }
 0x17c   :  { %p895_p4 = por %p894_p3, %p893_p2 }
 0x17e   :  { %p897_p6 = por %p896_p5, %p895_p4 }
 0x180   :  { %p898_p7 = pnand %p897_p6, %p891_p1 }
 0x182   :  { %901 = shalt.err (!%p898_p7)  }
 0x183   :  { %731 = dma.vmem_to_hbm [thread:$0]  %s729_s18, 8192, %s720_s21, [#allocation4]  ;;  %v566_v22 = vpop.trf.xlu1  ;;  %v598_v40 = vpop.trf.xlu0 }
 0x184   :  { %s735_s7 = sshra.s32 %s806_s5, 7  ;;  %s737_s2 = sshra.s32 %s807_s8, 3  ;;  %678 = vst [vmem:[#allocation3 + $0x100] sm:$0xff] %v566_v22  ;;  %647 = vst [vmem:[#allocation3 + $0x8] sm:$0xff] %v598_v40 }
 0x185   :  { %s811_s11 = sshll.u32 %s737_s2, 1  ;;  %s945_s8 = smov [#allocation3]  }
 0x186   :  { %s1158_s12 = sadd.s32 %s811_s11, %s735_s7  ;;  %s751_s13 = sshll.u32 %s945_s8, 4  ;;  %s752_s13 = int_to_ptr.vmem [resolvable:$true] %s751_s13 }
 0x187   :  { %v567_v15 = vpop.trf.xlu1  ;;  %v599_v41 = vpop.trf.xlu0  ;;  %s812_s5 = sshll.u32 %s1158_s12, 7  ;;  %p1167_p8 = scmp.ne.s32.totalorder %s1191_s0, %s1192_s1 }
 0x188   :  { %680 = vst [vmem:[#allocation3 + $0x110] sm:$0xff] %v567_v15  ;;  %649 = vst [vmem:[#allocation3 + $0x18] sm:$0xff] %v599_v41  ;;  %s742_s21 = scalar_lea.hbm %s1195_s4, %s812_s5  ;;  %s902_s22 = scalar_lea.vmem %s752_s13, 8192 }
 0x189   :  { %p903_p9 = scmp.ne.s32.totalorder %s752_s13, %s902_s22  ;;  %p909_p12 = scmp.lt.s32.totalorder %s752_s13, %s752_s13 }
 0x18a   :  { %p910_p13 = scmp.lt.s32.totalorder %s902_s22, %s902_s22 }
 0x18b   :  { %v568_v43 = vpop.trf.xlu1  ;;  %v600_v45 = vpop.trf.xlu0  ;;  %p904_p10 = pnand %p903_p9, %p1167_p8 }
 0x18c   :  { %682 = vst [vmem:[#allocation3 + $0x120] sm:$0xff] %v568_v43  ;;  %651 = vst [vmem:[#allocation3 + $0x28] sm:$0xff] %v600_v45  ;;  %p911_p0 = por %p910_p13, %p909_p12 }
 0x18d   :  { %p905_p11 = pneg %p904_p10 }
 0x18f   :  { %v569_v47 = vpop.trf.xlu1  ;;  %v601_v48 = vpop.trf.xlu0  ;;  %p912_p1 = pnand %p911_p0, %p905_p11 }
 0x190   :  { %684 = vst [vmem:[#allocation3 + $0x130] sm:$0xff] %v569_v47  ;;  %653 = vst [vmem:[#allocation3 + $0x38] sm:$0xff] %v601_v48 }
 0x193   :  { %v570_v30 = vpop.trf.xlu1  ;;  %v602_v49 = vpop.trf.xlu0 }
 0x194   :  { %686 = vst [vmem:[#allocation3 + $0x140] sm:$0xff] %v570_v30  ;;  %655 = vst [vmem:[#allocation3 + $0x48] sm:$0xff] %v602_v49 }
 0x197   :  { %v571_v24 = vpop.trf.xlu1  ;;  %v603_v50 = vpop.trf.xlu0 }
 0x198   :  { %688 = vst [vmem:[#allocation3 + $0x150] sm:$0xff] %v571_v24  ;;  %657 = vst [vmem:[#allocation3 + $0x58] sm:$0xff] %v603_v50 }
 0x19b   :  { %v572_v52 = vpop.trf.xlu1  ;;  %v604_v55 = vpop.trf.xlu0 }
 0x19c   :  { %690 = vst [vmem:[#allocation3 + $0x160] sm:$0xff] %v572_v52  ;;  %659 = vst [vmem:[#allocation3 + $0x68] sm:$0xff] %v604_v55 }
 0x19f   :  { %v573_v56 = vpop.trf.xlu1  ;;  %v605_v57 = vpop.trf.xlu0 }
 0x1a0   :  { %692 = vst [vmem:[#allocation3 + $0x170] sm:$0xff] %v573_v56  ;;  %661 = vst [vmem:[#allocation3 + $0x78] sm:$0xff] %v605_v57 }
 0x1a3   :  { %v574_v38 = vpop.trf.xlu1  ;;  %v606_v58 = vpop.trf.xlu0 }
 0x1a4   :  { %694 = vst [vmem:[#allocation3 + $0x180] sm:$0xff] %v574_v38  ;;  %663 = vst [vmem:[#allocation3 + $0x88] sm:$0xff] %v606_v58 }
 0x1a7   :  { %v575_v33 = vpop.trf.xlu1  ;;  %v607_v59 = vpop.trf.xlu0 }
 0x1a8   :  { %696 = vst [vmem:[#allocation3 + $0x190] sm:$0xff] %v575_v33  ;;  %665 = vst [vmem:[#allocation3 + $0x98] sm:$0xff] %v607_v59 }
 0x1ab   :  { %v576_v61 = vpop.trf.xlu1  ;;  %v608_v0 = vpop.trf.xlu0 }
 0x1ac   :  { %698 = vst [vmem:[#allocation3 + $0x1a0] sm:$0xff] %v576_v61  ;;  %667 = vst [vmem:[#allocation3 + $0xa8] sm:$0xff] %v608_v0 }
 0x1af   :  { %v577_v1 = vpop.trf.xlu1  ;;  %v609_v2 = vpop.trf.xlu0 }
 0x1b0   :  { %700 = vst [vmem:[#allocation3 + $0x1b0] sm:$0xff] %v577_v1  ;;  %669 = vst [vmem:[#allocation3 + $0xb8] sm:$0xff] %v609_v2 }
 0x1b3   :  { %v578_v46 = vpop.trf.xlu1  ;;  %v610_v3 = vpop.trf.xlu0 }
 0x1b4   :  { %702 = vst [vmem:[#allocation3 + $0x1c0] sm:$0xff] %v578_v46  ;;  %671 = vst [vmem:[#allocation3 + $0xc8] sm:$0xff] %v610_v3 }
 0x1b7   :  { %v579_v42 = vpop.trf.xlu1  ;;  %v611_v4 = vpop.trf.xlu0 }
 0x1b8   :  { %704 = vst [vmem:[#allocation3 + $0x1d0] sm:$0xff] %v579_v42  ;;  %673 = vst [vmem:[#allocation3 + $0xd8] sm:$0xff] %v611_v4 }
 0x1bb   :  { %v580_v7 = vpop.trf.xlu1  ;;  %v612_v9 = vpop.trf.xlu0 }
 0x1bc   :  { %706 = vst [vmem:[#allocation3 + $0x1e0] sm:$0xff] %v580_v7  ;;  %675 = vst [vmem:[#allocation3 + $0xe8] sm:$0xff] %v612_v9 }
 0x1bf   :  { %v581_v10 = vpop.trf.xlu1  ;;  %v613_v11 = vpop.trf.xlu0 }
 0x1c0   :  { %708 = vst [vmem:[#allocation3 + $0x1f0] sm:$0xff] %v581_v10  ;;  %677 = vst [vmem:[#allocation3 + $0xf8] sm:$0xff] %v613_v11 }
 0x1c3   :  { %v630_v54 = vpop.trf.xlu1 }
 0x1c4   :  { %679 = vst [vmem:[#allocation3 + $0x108] sm:$0xff] %v630_v54 }
 0x1c7   :  { %v631_v12 = vpop.trf.xlu1 }
 0x1c8   :  { %681 = vst [vmem:[#allocation3 + $0x118] sm:$0xff] %v631_v12 }
 0x1cb   :  { %v632_v51 = vpop.trf.xlu1 }
 0x1cc   :  { %683 = vst [vmem:[#allocation3 + $0x128] sm:$0xff] %v632_v51 }
 0x1cf   :  { %v633_v13 = vpop.trf.xlu1 }
 0x1d0   :  { %685 = vst [vmem:[#allocation3 + $0x138] sm:$0xff] %v633_v13 }
 0x1d3   :  { %v634_v17 = vpop.trf.xlu1 }
 0x1d4   :  { %687 = vst [vmem:[#allocation3 + $0x148] sm:$0xff] %v634_v17 }
 0x1d7   :  { %v635_v19 = vpop.trf.xlu1 }
 0x1d8   :  { %689 = vst [vmem:[#allocation3 + $0x158] sm:$0xff] %v635_v19 }
 0x1db   :  { %v636_v20 = vpop.trf.xlu1 }
 0x1dc   :  { %691 = vst [vmem:[#allocation3 + $0x168] sm:$0xff] %v636_v20 }
 0x1df   :  { %v637_v21 = vpop.trf.xlu1 }
 0x1e0   :  { %693 = vst [vmem:[#allocation3 + $0x178] sm:$0xff] %v637_v21 }
 0x1e3   :  { %v638_v62 = vpop.trf.xlu1 }
 0x1e4   :  { %695 = vst [vmem:[#allocation3 + $0x188] sm:$0xff] %v638_v62 }
 0x1e7   :  { %v639_v23 = vpop.trf.xlu1 }
 0x1e8   :  { %697 = vst [vmem:[#allocation3 + $0x198] sm:$0xff] %v639_v23 }
 0x1eb   :  { %v640_v25 = vpop.trf.xlu1 }
 0x1ec   :  { %699 = vst [vmem:[#allocation3 + $0x1a8] sm:$0xff] %v640_v25 }
 0x1ef   :  { %v641_v27 = vpop.trf.xlu1 }
 0x1f0   :  { %701 = vst [vmem:[#allocation3 + $0x1b8] sm:$0xff] %v641_v27 }
 0x1f3   :  { %v642_v60 = vpop.trf.xlu1 }
 0x1f4   :  { %703 = vst [vmem:[#allocation3 + $0x1c8] sm:$0xff] %v642_v60 }
 0x1f7   :  { %v643_v29 = vpop.trf.xlu1 }
 0x1f8   :  { %705 = vst [vmem:[#allocation3 + $0x1d8] sm:$0xff] %v643_v29 }
 0x1fb   :  { %v644_v14 = vpop.trf.xlu1 }
 0x1fc   :  { %707 = vst [vmem:[#allocation3 + $0x1e8] sm:$0xff] %v644_v14 }
 0x1ff   :  { %v645_v31 = vpop.trf.xlu1 }
 0x200   :  { %709 = vst [vmem:[#allocation3 + $0x1f8] sm:$0xff] %v645_v31 }
 0x201   :  { %915 = shalt.err (!%p912_p1)  }
 0x202   :  { %s916_s0 = scalar_lea.hbm %s742_s21, 8192  ;;  %p921_p5 = scmp.lt.u32.totalorder %s742_s21, %s1195_s4 }
 0x203   :  { %p917_p2 = scmp.ne.s32.totalorder %s742_s21, %s916_s0  ;;  %p922_p6 = scmp.lt.u32.totalorder %s892_s26, %s916_s0 }
 0x204   :  { %p924_p9 = scmp.lt.u32.totalorder %s916_s0, %s742_s21 }
 0x205   :  { %p918_p3 = pnand %p917_p2, %p1167_p8  ;;  %p923_p7 = por %p922_p6, %p921_p5 }
 0x207   :  { %p919_p4 = pneg %p918_p3  ;;  %p925_p10 = por %p924_p9, %p923_p7 }
 0x209   :  { %p926_p11 = pnand %p925_p10, %p919_p4 }
 0x20b   :  { %929 = shalt.err (!%p926_p11)  }
 0x20c   :  { %819 = dma.vmem_to_hbm [thread:$0]  (%p1167_p8), %s752_s13, 8192, %s742_s21, [#allocation4 + $0x1] }
 0x20d   :  { %934 = dma.done.wait [#allocation4], 8192 }
 0x20e   :  { %935 = vsyncadd [#allocation4], 4294959104 }
 0x20f   :  { %937 = dma.done.wait (%p1167_p8), [#allocation4 + $0x1], 8192 }
 0x210   :  { %939 = vsyncadd (%p1167_p8), [#allocation4 + $0x1], 4294959104 }
 0x211   :  { %765 = vsyncpa [#allocation9], 1 }
 0x212   :  { %766 = vsyncpa [#allocation11], 1 }
 0x213   :  { %767 = vsyncmov [#allocation4] }
 0x216   :  { %s768_s4 = vpop.sfrf %767 }
 0x217   :  { %p814_p12 = scmp.ne.s32.totalorder %s768_s4, 0 }
 0x219   :  { %772 = shalt.err (%p814_p12)  }
 0x21a   :  { %774 = vsyncmov [#allocation4 + $0x1] }
 0x21d   :  { %s775_s26 = vpop.sfrf %774 }
 0x21e   :  { %p815_p13 = scmp.ne.s32.totalorder %s775_s26, 0 }
 0x220   :  { %779 = shalt.err (%p815_p13)  }

</bundles_post_ra>
